<compile_context>
chip_gen: v6e
topology: v6e:2x2x1
jax: 0.10.0
libtpu: 0.0.40
codegen_flags: <defaults>
</compile_context>

<pallas_src>
import functools

import jax
import jax.numpy as jnp
from jax import lax
from jax.experimental import pallas as pl
from jax.experimental.pallas import tpu as pltpu

_LANES = 128
_BLOCK_ROWS = 4096        # (4096, 128) f32 = 2 MiB per input block
_ONESHOT_ROWS = 4096      # <= this many rows -> single grid-free call
_VMEM_LIMIT = 32 * 1024 * 1024


def _bce_terms(x, y):
    """Per-element BCE terms in f32, with torch's log clamp at -100."""
    x = x.astype(jnp.float32)
    y = y.astype(jnp.float32)
    log_x = jnp.maximum(jnp.log(x), -100.0)
    log_1mx = jnp.maximum(jnp.log(1.0 - x), -100.0)
    return -(y * log_x + (1.0 - y) * log_1mx)


def _bce_single_kernel(x_ref, y_ref, o_ref):
    """Small inputs: whole (rows, 128) slab in VMEM, per-lane partial sums out."""
    loss = _bce_terms(x_ref[...], y_ref[...])
    o_ref[...] = jnp.sum(loss, axis=0, keepdims=True)          # (1, 128)


def _bce_tiled_kernel(x_ref, y_ref, o_ref, acc_ref, *,
                      rows_total, block_rows, steps_per_half, mask_needed):
    """Large inputs: 2 MiB row blocks, vreg (8,128) accumulator, 2 partial sums."""
    half = pl.program_id(0)       # "parallel" axis: one partial sum per half
    step = pl.program_id(1)       # "arbitrary" reduction axis

    @pl.when(step == 0)
    def _():
        acc_ref[...] = jnp.zeros_like(acc_ref)

    loss = _bce_terms(x_ref[...], y_ref[...])                  # (block_rows, 128)
    groups = block_rows // 8

    def _accumulate(vals):
        # Pure sublane-aligned vreg adds: (groups, 8, 128) summed over axis 0.
        acc_ref[...] += jnp.sum(vals.reshape(groups, 8, _LANES), axis=0)

    if mask_needed:
        # Row-based bound (never a flat element index -> no int32 overflow;
        # rows_total <= ~2e8 even for 96 GiB of f32 data).
        start_row = (half * steps_per_half + step) * block_rows
        rem = rows_total - start_row

        @pl.when(rem >= block_rows)          # full block: no mask work
        def _():
            _accumulate(loss)

        @pl.when(rem < block_rows)           # partial / fully out-of-range block
        def _():
            row = lax.broadcasted_iota(jnp.int32, (block_rows, _LANES), 0)
            _accumulate(jnp.where(row < rem, loss, 0.0))
    else:
        _accumulate(loss)

    @pl.when(step == steps_per_half - 1)
    def _():
        # Per-lane partial sums for this half; final 128-sum done in the wrapper.
        o_ref[...] = jnp.sum(acc_ref[...], axis=0, keepdims=True).reshape(
            1, 1, _LANES)


def bce_loss(x, y):
    """Mean binary cross-entropy, matching torch.nn.BCELoss()(x, y)."""
    assert x.shape == y.shape
    n = int(x.size)
    inv_n = 1.0 / float(n)

    def _prep(a):
        if a.dtype not in (jnp.float32, jnp.bfloat16, jnp.float16):
            a = a.astype(jnp.float32)
        return jnp.ravel(a)

    xf, yf = _prep(x), _prep(y)

    rows_total = -(-n // _LANES)              # cdiv(n, 128)
    padded = rows_total * _LANES
    if padded != n:
        # Pad with (x=1, y=1): that BCE term is exactly 0, so the lane tail
        # needs no in-kernel mask at all.
        # TODO(synk): for huge non-lane-aligned inputs this pad is still a full
        # HBM copy; a 1-D-block main pass + tiny tail call would avoid it.
        pad = padded - n
        xf = jnp.pad(xf, (0, pad), constant_values=1.0)
        yf = jnp.pad(yf, (0, pad), constant_values=1.0)

    x2 = xf.reshape(rows_total, _LANES)       # free reshape when n % 128 == 0
    y2 = yf.reshape(rows_total, _LANES)

    if rows_total <= _ONESHOT_ROWS:
        out = pl.pallas_call(
            _bce_single_kernel,
            out_shape=jax.ShapeDtypeStruct((1, _LANES), jnp.float32),
            compiler_params=pltpu.CompilerParams(vmem_limit_bytes=_VMEM_LIMIT),
        )(x2, y2)
        return jnp.sum(out) * inv_n

    num_steps = -(-rows_total // _BLOCK_ROWS)
    steps_per_half = -(-num_steps // 2)
    # Static: can any block be partial or fully out of range?
    mask_needed = (2 * steps_per_half * _BLOCK_ROWS) != rows_total

    kernel = functools.partial(
        _bce_tiled_kernel,
        rows_total=rows_total, block_rows=_BLOCK_ROWS,
        steps_per_half=steps_per_half, mask_needed=mask_needed)

    def in_map(c, k):
        # Clamp so a fully out-of-range step (odd num_steps) DMAs valid data;
        # its contribution is zeroed by the rem < block_rows mask branch.
        return (jnp.minimum(c * steps_per_half + k, num_steps - 1), 0)

    bytes_accessed = int(x2.size * x2.dtype.itemsize
                         + y2.size * y2.dtype.itemsize)

    out = pl.pallas_call(
        kernel,
        out_shape=jax.ShapeDtypeStruct((2, 1, _LANES), jnp.float32),
        grid=(2, steps_per_half),
        in_specs=[
            pl.BlockSpec((_BLOCK_ROWS, _LANES), in_map),
            pl.BlockSpec((_BLOCK_ROWS, _LANES), in_map),
        ],
        out_specs=pl.BlockSpec((1, 1, _LANES), lambda c, k: (c, 0, 0)),
        scratch_shapes=[pltpu.VMEM((8, _LANES), jnp.float32)],
        compiler_params=pltpu.CompilerParams(
            dimension_semantics=("parallel", "arbitrary"),
            vmem_limit_bytes=_VMEM_LIMIT),
        cost_estimate=pl.CostEstimate(
            flops=9 * n, transcendentals=2 * n, bytes_accessed=bytes_accessed),
    )(x2, y2)
    return jnp.sum(out) * inv_n


def _bce_ref(x, y):
    xf = x.astype(jnp.float32)
    yf = y.astype(jnp.float32)
    return jnp.mean(-(yf * jnp.maximum(jnp.log(xf), -100.0)
                      + (1.0 - yf) * jnp.maximum(jnp.log(1.0 - xf), -100.0)))


if __name__ == "__main__":
    key = jax.random.PRNGKey(0)
    kx, ky, kx2, ky2, kx3, ky3, kx4, ky4 = jax.random.split(key, 8)

    # Primary: the shape the PyTorch module is exercised with.
    x = jax.nn.sigmoid(jax.random.normal(kx, (2, 4, 16, 16), jnp.float32))
    y = jax.random.uniform(ky, (2, 4, 16, 16), jnp.float32)
    loss = bce_loss(x, y)
    jax.block_until_ready(loss)
    assert jnp.allclose(loss, _bce_ref(x, y), atol=1e-5, rtol=1e-5), loss

    # Non-lane-divisible element count (lane-tail pad path).
    x_odd = jax.nn.sigmoid(jax.random.normal(kx2, (3, 5, 7), jnp.float32))
    y_odd = jax.random.uniform(ky2, (3, 5, 7), jnp.float32)
    loss_odd = bce_loss(x_odd, y_odd)
    jax.block_until_ready(loss_odd)
    assert jnp.allclose(loss_odd, _bce_ref(x_odd, y_odd), atol=1e-5, rtol=1e-5)

    # Tiled two-partial-sum path, block-divisible (no mask branches).
    x_t = jax.nn.sigmoid(jax.random.normal(kx3, (1024, 1024), jnp.float32))
    y_t = jax.random.uniform(ky3, (1024, 1024), jnp.float32)
    loss_t = bce_loss(x_t, y_t)
    jax.block_until_ready(loss_t)
    assert jnp.allclose(loss_t, _bce_ref(x_t, y_t), atol=1e-5, rtol=1e-4)

    # Tiled path with a partial block and a fully out-of-range (clamped) block.
    x_m = jax.nn.sigmoid(jax.random.normal(kx4, (1200, 999), jnp.float32))
    y_m = jax.random.uniform(ky4, (1200, 999), jnp.float32)
    loss_m = bce_loss(x_m, y_m)
    jax.block_until_ready(loss_m)
    assert jnp.allclose(loss_m, _bce_ref(x_m, y_m), atol=1e-5, rtol=1e-4)

    print("KERNEL_OK")
</pallas_src>

<mosaic_0001>
module attributes {stable_mosaic.version = 11 : i64} {
  func.func @_bce_single_kernel(%arg0: memref<16x128xf32, #tpu.memory_space<vmem>>, %arg1: memref<16x128xf32, #tpu.memory_space<vmem>>, %arg2: memref<1x128xf32, #tpu.memory_space<vmem>>) attributes {dimension_semantics = [], scalar_prefetch = 0 : i64, scratch_operands = 0 : i64, tpu.core_type = #tpu.core_type<tc>} {
    %c0 = arith.constant 0 : index
    %c0_0 = arith.constant 0 : index
    %0 = vector.load %arg0[%c0, %c0_0] : memref<16x128xf32, #tpu.memory_space<vmem>>, vector<16x128xf32>
    %c0_1 = arith.constant 0 : index
    %c0_2 = arith.constant 0 : index
    %1 = vector.load %arg1[%c0_1, %c0_2] : memref<16x128xf32, #tpu.memory_space<vmem>>, vector<16x128xf32>
    %2 = math.log %0 : vector<16x128xf32>
    %cst = arith.constant -1.000000e+02 : f32
    %3 = vector.broadcast %cst : f32 to vector<16x128xf32>
    %4 = arith.maximumf %2, %3 : vector<16x128xf32>
    %cst_3 = arith.constant 1.000000e+00 : f32
    %5 = vector.broadcast %cst_3 : f32 to vector<16x128xf32>
    %6 = arith.subf %5, %0 : vector<16x128xf32>
    %7 = math.log %6 : vector<16x128xf32>
    %cst_4 = arith.constant -1.000000e+02 : f32
    %8 = vector.broadcast %cst_4 : f32 to vector<16x128xf32>
    %9 = arith.maximumf %7, %8 : vector<16x128xf32>
    %10 = arith.mulf %1, %4 : vector<16x128xf32>
    %cst_5 = arith.constant 1.000000e+00 : f32
    %11 = vector.broadcast %cst_5 : f32 to vector<16x128xf32>
    %12 = arith.subf %11, %1 : vector<16x128xf32>
    %13 = arith.mulf %12, %9 : vector<16x128xf32>
    %14 = arith.addf %10, %13 : vector<16x128xf32>
    %cst_6 = arith.constant 0.000000e+00 : f32
    %15 = vector.broadcast %cst_6 : f32 to vector<16x128xf32>
    %16 = arith.subf %15, %14 : vector<16x128xf32>
    %cst_7 = arith.constant dense<0.000000e+00> : vector<128xf32>
    %17 = vector.multi_reduction <add>, %16, %cst_7 [0] : vector<16x128xf32> to vector<128xf32>
    %18 = vector.shape_cast %17 : vector<128xf32> to vector<1x128xf32>
    %c0_8 = arith.constant 0 : index
    %c0_9 = arith.constant 0 : index
    %19 = vector.load %arg2[%c0_8, %c0_9] : memref<1x128xf32, #tpu.memory_space<vmem>>, vector<1x128xf32>
    tpu.vector_store %arg2[%c0_8, %c0_9], %18 {strides = array<i32>} : memref<1x128xf32, #tpu.memory_space<vmem>>, vector<1x128xf32>,
    return
  }
}

</mosaic_0001>

<bundles_post_ra>
// kernel: tpu_custom_call.1
= control target key start
LH: loop header
LB: loop body
LE: loop exit
PB: predicated region body
PF: predicated region fallthrough
CT: control target
= control target key end

     0   :  { %7 = vsyncpa [#allocation3], 0  ;;  %s200_s0 = inlined_call_operand.hbm [shape: f32[16,128], index: 0, kind: input, shape index: {}]   ;;  %s201_s1 = inlined_call_operand.hbm [shape: f32[16,128], index: 1, kind: input, shape index: {}]   ;;  %s202_s2 = inlined_call_operand.hbm [shape: f32[1,128], index: 2, kind: output, shape index: {}]  }
   0x1   :  { %8 = vsyncpa [#allocation6], 0 }
   0x2   :  { %9 = vsyncpa [#allocation4], 0  ;;  %s171_s9 = smov [#allocation2]  }
   0x3   :  { %s15_s10 = sshll.u32 %s171_s9, 4  ;;  %s16_s10 = int_to_ptr.vmem [resolvable:$true] %s15_s10 }
   0x4   :  { %s113_s11 = scalar_lea.vmem %s16_s10, 256  ;;  %p118_p1 = scmp.lt.s32.totalorder %s16_s10, %s16_s10 }
   0x5   :  { %p114_p0 = scmp.ne.s32.totalorder %s16_s10, %s113_s11  ;;  %p119_p2 = scmp.lt.s32.totalorder %s113_s11, %s113_s11 }
   0x7   :  { %p120_p3 = por %p119_p2, %p118_p1 }
   0x9   :  { %p121_p4 = pnand %p120_p3, %p114_p0 }
   0xb   :  { %124 = shalt.err (!%p121_p4)
}
   0xc   :  { %s172_s12 = smov 128   ;;  %s173_s13 = smov 8  }
   0xd   :  { %21 = dma.hbm_to_vmem [thread:$0]  %s200_s0, 256, %s16_s10, [#allocation3], %s172_s12, %s172_s12, %s173_s13  }
   0xe   :  { %s174_s16 = smov [#allocation5]  }
   0xf   :  { %s27_s17 = sshll.u32 %s174_s16, 4  ;;  %s28_s17 = int_to_ptr.vmem [resolvable:$true] %s27_s17 }
  0x10   :  { %s133_s18 = scalar_lea.vmem %s28_s17, 256  ;;  %p138_p6 = scmp.lt.s32.totalorder %s28_s17, %s28_s17 }
  0x11   :  { %p134_p5 = scmp.ne.s32.totalorder %s28_s17, %s133_s18  ;;  %p139_p7 = scmp.lt.s32.totalorder %s133_s18, %s133_s18 }
  0x13   :  { %p140_p8 = por %p139_p7, %p138_p6 }
  0x15   :  { %p141_p9 = pnand %p140_p8, %p134_p5 }
  0x17   :  { %144 = shalt.err (!%p141_p9)
}
  0x18   :  { %33 = dma.hbm_to_vmem [thread:$0]  %s201_s1, 256, %s28_s17, [#allocation6], %s172_s12, %s172_s12, %s173_s13  }
  0x19   :  { %165 = dma.done.wait [#allocation3], 256  }
  0x1a   :  { %166 = vsyncadd [#allocation3], 4294967040 }
  0x1b   :  { %167 = dma.done.wait [#allocation6], 256  }
  0x1c   :  { %168 = vsyncadd [#allocation6], 4294967040  ;;  %v40_v0 = vld [vmem:[#allocation2] sm:$0xff]  ;;  %v41_v1 = vld [vmem:[#allocation2 + $0x8] sm:$0xff]  ;;  %s175_s0 = smov [#allocation7]  }
  0x1d   :  { %97 = vlog2.f32 %v40_v0  ;;  %v50_v2 = vsub.f32 1.0, %v40_v0  ;;  %v51_v3 = vsub.f32 1.0, %v41_v1  ;;  %v42_v5 = vld [vmem:[#allocation5] sm:$0xff]  ;;  %v43_v7 = vld [vmem:[#allocation5 + $0x8] sm:$0xff]  ;;  %s82_s1 = sshll.u32 %s175_s0, 4  ;;  %s83_s1 = int_to_ptr.vmem [resolvable:$true] %s82_s1 }
  0x1e   :  { %99 = vlog2.f32 %v41_v1  ;;  %v60_v14 = vsub.f32 1.0, %v42_v5  ;;  %v61_v17 = vsub.f32 1.0, %v43_v7  ;;  %s145_s21 = scalar_lea.vmem %s83_s1, 16  ;;  %s149_s22 = scalar_lea.vmem %s83_s1, 32 }
  0x1f   :  { %101 = vlog2.f32 %v50_v2  ;;  %p146_p10 = scmp.ne.s32.totalorder %s83_s1, %s145_s21  ;;  %p150_p11 = scmp.lt.s32.totalorder %s83_s1, %s83_s1 }
  0x20   :  { %103 = vlog2.f32 %v51_v3  ;;  %p151_p12 = scmp.lt.s32.totalorder %s149_s22, %s145_s21 }
  0x22   :  { %p152_p13 = por %p151_p12, %p150_p11 }
  0x24   :  { %p153_p0 = pnand %p152_p13, %p146_p10 }
  0x2a   :  { %v98_v4 = vpop.eup %97 }
  0x2b   :  { %v100_v6 = vpop.eup %99  ;;  %v45_v8 = vmul.f32 0.6931472, %v98_v4 }
  0x2c   :  { %v102_v9 = vpop.eup %101  ;;  %v47_v10 = vmul.f32 0.6931472, %v100_v6 }
  0x2d   :  { %v104_v11 = vpop.eup %103  ;;  %v48_v12 = vmax.f32 %v45_v8, -100.0  ;;  %v53_v13 = vmul.f32 0.6931472, %v102_v9 }
  0x2e   :  { %v49_v15 = vmax.f32 %v47_v10, -100.0  ;;  %v55_v16 = vmul.f32 0.6931472, %v104_v11 }
  0x2f   :  { %v56_v18 = vmax.f32 %v53_v13, -100.0  ;;  %v58_v19 = vmul.f32 %v48_v12, %v42_v5 }
  0x30   :  { %v57_v20 = vmax.f32 %v55_v16, -100.0  ;;  %v59_v21 = vmul.f32 %v49_v15, %v43_v7 }
  0x31   :  { %v62_v22 = vmul.f32 %v60_v14, %v56_v18 }
  0x32   :  { %v63_v23 = vmul.f32 %v61_v17, %v57_v20 }
  0x33   :  { %v64_v24 = vadd.f32 %v62_v22, %v58_v19 }
  0x34   :  { %v65_v25 = vadd.f32 %v63_v23, %v59_v21 }
  0x35   :  { %v66_v26 = vsub.f32 0.0, %v64_v24 }
  0x36   :  { %v67_v27 = vsub.f32 0.0, %v65_v25 }
  0x38   :  { %v68_v28 = vadd.f32 %v67_v27, %v66_v26 }
  0x3a   :  { %v69_v29 = vrot.slane %v68_v28, 4 }
  0x3c   :  { %v70_v30 = vadd.f32 %v69_v29, %v68_v28 }
  0x3e   :  { %v71_v31 = vrot.slane %v70_v30, 2 }
  0x40   :  { %v72_v32 = vadd.f32 %v71_v31, %v70_v30 }
  0x42   :  { %v73_v33 = vrot.slane %v72_v32, 1 }
  0x44   :  { %v74_v34 = vadd.f32 %v73_v33, %v72_v32 }
  0x46   :  { %75 = vst [vmem:[#allocation7] sm:$0x1] %v74_v34 }
  0x47   :  { %156 = shalt.err (!%p153_p0)
}
  0x48   :  { %85 = dma.vmem_to_hbm [thread:$0]  %s83_s1, 16, %s202_s2, [#allocation4]  }
  0x49   :  { %169 = dma.done.wait [#allocation4], 16  }
  0x4a   :  { %170 = vsyncadd [#allocation4], 4294967280 }
  0x4b   :  { %89 = vsyncpa [#allocation3], 1 }
  0x4c   :  { %90 = vsyncpa [#allocation6], 1 }
  0x4d   :  { %91 = vsyncpa [#allocation4], 1 }

</bundles_post_ra>
